<compile_context>
chip_gen: v6e
topology: v6e:2x2x1
jax: 0.10.0
libtpu: 0.0.40
codegen_flags: <defaults>
</compile_context>

<pallas_src>
import jax
import jax.numpy as jnp
from jax.experimental import pallas as pl
from jax.experimental.pallas import tpu as pltpu

_LANE = 128
_SUBLANE = 8


def _round_up(x, m):
    return (x + m - 1) // m * m


def linear_gelu_kernel(x_ref, w_ref, b_ref, o_ref):
    # x_ref: [tm, K]   w_ref: [K, tn] (pre-transposed [in, out])
    # b_ref: [1, tn]   o_ref: [tm, tn]
    # Native-dtype operands straight into the MXU; f32 accumulation.
    y = jnp.dot(x_ref[...], w_ref[...], preferred_element_type=jnp.float32)
    y = y + b_ref[...].astype(jnp.float32)
    # Exact GELU (PyTorch nn.GELU default): 0.5 * y * (1 + erf(y / sqrt(2)))
    inv_sqrt2 = jnp.float32(0.7071067811865476)
    g = 0.5 * y * (1.0 + jax.lax.erf(y * inv_sqrt2))
    o_ref[...] = g.astype(o_ref.dtype)


def prepare_params(weight, bias):
    """One-time parameter prep (call OUTSIDE the per-step forward path).

    Transposes the PyTorch-layout [out, in] weight to [in, out] and zero-pads
    both dims to a multiple of 128 so every kernel call sees lane-dense tiles
    and never pays a per-call transpose/pad HBM pass.
    """
    c_out, c_in = weight.shape
    assert c_out == c_in, "Layer(count) uses a square Linear"
    c_pad = _round_up(c_in, _LANE)
    w_t = weight.T  # [in, out]
    if c_pad != c_in:
        w_p = jnp.zeros((c_pad, c_pad), w_t.dtype).at[:c_in, :c_out].set(w_t)
        b_p = jnp.zeros((1, c_pad), bias.dtype).at[0, :c_out].set(bias)
    else:
        w_p, b_p = w_t, bias.reshape(1, c_pad)
    return w_p, b_p


def layer_forward(x, w_padded, b_padded, *, tile_m=None, tile_n=None):
    """x: [B, C]; w_padded: [C_pad, C_pad] ([in, out]); b_padded: [1, C_pad].

    Returns GELU(x @ W^T + b) with shape [B, C].
    """
    B, C = x.shape
    C_pad = w_padded.shape[0]

    # ---- tile selection ----------------------------------------------------
    if tile_m is None:
        # Sublane-aligned; capped so large batches get a multi-step, pipelined
        # grid (per-step overhead ~0.35us) instead of one giant serial tile.
        tile_m = min(512, _round_up(B, _SUBLANE))
    tile_m = _round_up(tile_m, _SUBLANE)
    B_pad = _round_up(B, tile_m)

    if tile_n is None:
        if C_pad <= 1024:
            tile_n = C_pad  # whole weight stays VMEM-resident
        else:
            tile_n = _LANE
            for cand in (512, 384, 256, 128):
                if C_pad % cand == 0:
                    tile_n = cand
                    break
    assert C_pad % tile_n == 0 and tile_n % _LANE == 0
    # Note: K (=C_pad) is kept whole per step; for C so large that a
    # (tile_m, C_pad) x-tile cannot fit VMEM, add a K grid axis with an f32
    # accumulator + pl.when init/finalize.

    # ---- pad activations to the tile grid (no-op when already aligned) -----
    if (B_pad, C_pad) != (B, C):
        x_in = jnp.zeros((B_pad, C_pad), x.dtype).at[:B, :C].set(x)
    else:
        x_in = x

    grid = (B_pad // tile_m, C_pad // tile_n)

    x_item = jnp.dtype(x.dtype).itemsize
    w_item = jnp.dtype(w_padded.dtype).itemsize
    b_item = jnp.dtype(b_padded.dtype).itemsize

    cost = pl.CostEstimate(
        flops=2 * B_pad * C_pad * C_pad,
        transcendentals=B_pad * C_pad,
        bytes_accessed=(2 * B_pad * C_pad * x_item      # x in + out
                        + C_pad * C_pad * w_item        # weight
                        + C_pad * b_item),              # bias
    )

    # Raise the scoped-VMEM limit only when the working set needs it; keep
    # headroom under v7x's 64 MiB physical VMEM.
    vmem_need = (2 * tile_m * C_pad * x_item            # double-buffered x
                 + 2 * C_pad * tile_n * w_item          # weight buffers
                 + 2 * tile_m * tile_n * x_item         # double-buffered out
                 + 2 * tile_n * b_item)
    vmem_limit = None
    if vmem_need > (30 << 20):
        vmem_limit = int(min(vmem_need + (4 << 20), 60 << 20))

    out = pl.pallas_call(
        linear_gelu_kernel,
        out_shape=jax.ShapeDtypeStruct((B_pad, C_pad), x.dtype),
        grid_spec=pltpu.PrefetchScalarGridSpec(
            num_scalar_prefetch=0,
            grid=grid,
            in_specs=[
                pl.BlockSpec((tile_m, C_pad), lambda i, j: (i, 0)),
                pl.BlockSpec((C_pad, tile_n), lambda i, j: (0, j)),  # resident
                pl.BlockSpec((1, tile_n), lambda i, j: (0, j)),
            ],
            out_specs=pl.BlockSpec((tile_m, tile_n), lambda i, j: (i, j)),
        ),
        compiler_params=pltpu.CompilerParams(
            dimension_semantics=("parallel", "parallel"),
            vmem_limit_bytes=vmem_limit,
        ),
        cost_estimate=cost,
    )(x_in, w_padded, b_padded)

    if (B_pad, C_pad) != (B, C):
        out = out[:B, :C]
    return out


if __name__ == "__main__":
    count = 32   # Layer(count): Linear(count, count) + GELU
    batch = 8

    key = jax.random.PRNGKey(0)
    kx, kw, kb = jax.random.split(key, 3)

    # Deterministic PyTorch-like init: uniform(-1/sqrt(count), 1/sqrt(count))
    bound = 1.0 / jnp.sqrt(jnp.float32(count))
    weight = jax.random.uniform(kw, (count, count), jnp.float32, -bound, bound)  # [out, in]
    bias = jax.random.uniform(kb, (count,), jnp.float32, -bound, bound)
    x = jax.random.normal(kx, (batch, count), jnp.float32)

    # One-time param prep (transpose + lane-dense pad) — not in the hot path.
    w_p, b_p = prepare_params(weight, bias)

    out = layer_forward(x, w_p, b_p)
    out = jax.block_until_ready(out)

    # Reference check in plain JAX (exact erf GELU, like nn.GELU default).
    ref = x @ weight.T + bias
    ref = 0.5 * ref * (1.0 + jax.lax.erf(ref / jnp.sqrt(2.0)))
    assert out.shape == (batch, count)
    assert jnp.allclose(out, ref, atol=1e-5, rtol=1e-5)

    print("KERNEL_OK")
</pallas_src>

<mosaic_0001>
module attributes {stable_mosaic.version = 11 : i64} {
  func.func @linear_gelu_kernel(%arg0: i32, %arg1: i32, %arg2: memref<8x128xf32, #tpu.memory_space<vmem>>, %arg3: memref<128x128xf32, #tpu.memory_space<vmem>>, %arg4: memref<1x128xf32, #tpu.memory_space<vmem>>, %arg5: memref<8x128xf32, #tpu.memory_space<vmem>>) attributes {dimension_semantics = [#tpu.dimension_semantics<parallel>, #tpu.dimension_semantics<parallel>], iteration_bounds = array<i64: 1, 1>, scalar_prefetch = 0 : i64, scratch_operands = 0 : i64, tpu.core_type = #tpu.core_type<tc>, window_params = [{transform_indices = @transform_0, window_bounds = array<i64: 8, 128>}, {transform_indices = @transform_1, window_bounds = array<i64: 128, 128>}, {transform_indices = @transform_2, window_bounds = array<i64: 1, 128>}, {transform_indices = @transform_3, window_bounds = array<i64: 8, 128>}]} {
    %c0 = arith.constant 0 : index
    %c0_0 = arith.constant 0 : index
    %0 = vector.load %arg2[%c0, %c0_0] : memref<8x128xf32, #tpu.memory_space<vmem>>, vector<8x128xf32>
    %c0_1 = arith.constant 0 : index
    %c0_2 = arith.constant 0 : index
    %1 = vector.load %arg3[%c0_1, %c0_2] : memref<128x128xf32, #tpu.memory_space<vmem>>, vector<128x128xf32>
    %cst = arith.constant dense<0.000000e+00> : vector<8x128xf32>
    %2 = tpu.matmul %0, %1, %cst {dimension_numbers = #tpu.dot_dimension_numbers<[1], [0], [0], [1], [0, 0, 1, 1], [], []>} : vector<8x128xf32>, vector<128x128xf32>, vector<8x128xf32> -> vector<8x128xf32>
    %c0_3 = arith.constant 0 : index
    %c0_4 = arith.constant 0 : index
    %3 = vector.load %arg4[%c0_3, %c0_4] : memref<1x128xf32, #tpu.memory_space<vmem>>, vector<1x128xf32>
    %4 = vector.broadcast %3 : vector<1x128xf32> to vector<8x128xf32>
    %5 = arith.addf %2, %4 : vector<8x128xf32>
    %cst_5 = arith.constant 5.000000e-01 : f32
    %6 = vector.broadcast %cst_5 : f32 to vector<8x128xf32>
    %7 = arith.mulf %6, %5 : vector<8x128xf32>
    %cst_6 = arith.constant 0.707106769 : f32
    %8 = vector.broadcast %cst_6 : f32 to vector<8x128xf32>
    %9 = arith.mulf %5, %8 : vector<8x128xf32>
    %10 = math.erf %9 : vector<8x128xf32>
    %cst_7 = arith.constant 1.000000e+00 : f32
    %11 = vector.broadcast %cst_7 : f32 to vector<8x128xf32>
    %12 = arith.addf %11, %10 : vector<8x128xf32>
    %13 = arith.mulf %7, %12 : vector<8x128xf32>
    %c0_8 = arith.constant 0 : index
    %c0_9 = arith.constant 0 : index
    %14 = vector.load %arg5[%c0_8, %c0_9] : memref<8x128xf32, #tpu.memory_space<vmem>>, vector<8x128xf32>
    tpu.vector_store %arg5[%c0_8, %c0_9], %13 {strides = array<i32>} : memref<8x128xf32, #tpu.memory_space<vmem>>, vector<8x128xf32>,
    return
  }
  func.func @transform_0(%arg0: i32, %arg1: i32) -> (i32, i32) {
    %c0_i32 = arith.constant 0 : i32
    %c0_i32_0 = arith.constant 0 : i32
    return %arg0, %c0_i32 : i32, i32
  }
  func.func @transform_1(%arg0: i32, %arg1: i32) -> (i32, i32) {
    %c0_i32 = arith.constant 0 : i32
    %c0_i32_0 = arith.constant 0 : i32
    return %c0_i32, %arg1 : i32, i32
  }
  func.func @transform_2(%arg0: i32, %arg1: i32) -> (i32, i32) {
    %c0_i32 = arith.constant 0 : i32
    %c0_i32_0 = arith.constant 0 : i32
    return %c0_i32, %arg1 : i32, i32
  }
  func.func @transform_3(%arg0: i32, %arg1: i32) -> (i32, i32) {
    %c0_i32 = arith.constant 0 : i32
    return %arg0, %arg1 : i32, i32
  }
}

</mosaic_0001>

<bundles_post_ra>
// kernel: tpu_custom_call.1
= control target key start
LH: loop header
LB: loop body
LE: loop exit
PB: predicated region body
PF: predicated region fallthrough
CT: control target
= control target key end

     0   :  { %8 = vsyncpa [#allocation3], 0  ;;  %s324_s0 = inlined_call_operand.hbm [shape: f32[8,128], index: 0, kind: input, shape index: {}]   ;;  %s325_s1 = inlined_call_operand.hbm [shape: f32[128,128], index: 1, kind: input, shape index: {}]   ;;  %s326_s2 = inlined_call_operand.vmem [shape: f32[1,128], index: 2, kind: input, shape index: {}]   ;;  %s327_s3 = inlined_call_operand.hbm [shape: f32[8,128], index: 3, kind: output, shape index: {}]  }
   0x1   :  { %9 = vsyncpa [#allocation6], 0 }
   0x2   :  { %10 = vsyncpa [#allocation4], 0  ;;  %s285_s12 = smov [#allocation2]   ;;  %s286_s14 = smov [#allocation5]  }
   0x3   :  { %s17_s13 = sshll.u32 %s285_s12, 4  ;;  %s26_s15 = sshll.u32 %s286_s14, 4  ;;  %s18_s13 = int_to_ptr.vmem [resolvable:$true] %s17_s13  ;;  %s27_s15 = int_to_ptr.vmem [resolvable:$true] %s26_s15 }
   0x4   :  { %s227_s16 = scalar_lea.vmem %s18_s13, 128  ;;  %p232_p1 = scmp.lt.s32.totalorder %s18_s13, %s18_s13 }
   0x5   :  { %p228_p0 = scmp.ne.s32.totalorder %s18_s13, %s227_s16  ;;  %p233_p2 = scmp.lt.s32.totalorder %s227_s16, %s227_s16 }
   0x7   :  { %p234_p3 = por %p233_p2, %p232_p1 }
   0x9   :  { %p235_p4 = pnand %p234_p3, %p228_p0 }
   0xb   :  { %238 = shalt.err (!%p235_p4)
}
   0xc   :  { %20 = dma.hbm_to_vmem [thread:$0]  %s324_s0, 128, %s18_s13, [#allocation3]  }
   0xd   :  { %s247_s19 = scalar_lea.vmem %s27_s15, 2048  ;;  %p252_p6 = scmp.lt.s32.totalorder %s27_s15, %s27_s15 }
   0xe   :  { %p248_p5 = scmp.ne.s32.totalorder %s27_s15, %s247_s19  ;;  %p253_p7 = scmp.lt.s32.totalorder %s247_s19, %s247_s19 }
  0x10   :  { %p254_p8 = por %p253_p7, %p252_p6 }
  0x12   :  { %p255_p9 = pnand %p254_p8, %p248_p5 }
  0x14   :  { %258 = shalt.err (!%p255_p9)
}
  0x15   :  { %s287_s20 = smov 128   ;;  %s288_s21 = smov 8  }
  0x16   :  { %32 = dma.hbm_to_vmem [thread:$0]  %s325_s1, 2048, %s27_s15, [#allocation6], %s287_s20, %s287_s20, %s288_s21  }
  0x17   :  { %279 = dma.done.wait [#allocation3], 128  }
  0x18   :  { %280 = vsyncadd [#allocation3], 4294967168 }
  0x19   :  { %281 = dma.done.wait [#allocation6], 2048  }
  0x1a   :  { %282 = vsyncadd [#allocation6], 4294965248  ;;  %v289_v0 = vmov 0.0   ;;  %vm290_vm0 = vmmov 0   ;;  %v57_v1 = vld [vmem:[#allocation5 + $0x78] sm:$0xff]  ;;  %v56_v2 = vld [vmem:[#allocation5 + $0x70] sm:$0xff] }
  0x1b   :  { %175 = vmatprep.subr.mxu0 %v289_v0  ;;  %207 = vmatprep.mubr.msk.f32.mxu0 %vm290_vm0, %v289_v0  ;;  %v55_v3 = vld [vmem:[#allocation5 + $0x68] sm:$0xff]  ;;  %v54_v4 = vld [vmem:[#allocation5 + $0x60] sm:$0xff]  ;;  %v53_v5 = vld [vmem:[#allocation5 + $0x58] sm:$0xff]  ;;  %s291_s24 = smov [#allocation7]  }
  0x1c   :  { %176 = vmatpush3.msra.mxu0 %v57_v1  ;;  %v52_v6 = vld [vmem:[#allocation5 + $0x50] sm:$0xff]  ;;  %v51_v7 = vld [vmem:[#allocation5 + $0x48] sm:$0xff]  ;;  %v50_v8 = vld [vmem:[#allocation5 + $0x40] sm:$0xff]  ;;  %s147_s25 = sshll.u32 %s291_s24, 4  ;;  %s148_s25 = int_to_ptr.vmem [resolvable:$true] %s147_s25 }
  0x1d   :  { %177 = vmatprep.subr.mxu0 %v289_v0  ;;  %v49_v9 = vld [vmem:[#allocation5 + $0x38] sm:$0xff]  ;;  %v48_v10 = vld [vmem:[#allocation5 + $0x30] sm:$0xff]  ;;  %v47_v11 = vld [vmem:[#allocation5 + $0x28] sm:$0xff]  ;;  %s259_s26 = scalar_lea.vmem %s148_s25, 128  ;;  %p264_p11 = scmp.lt.s32.totalorder %s148_s25, %s148_s25 }
  0x1e   :  { %178 = vmatpush3.msra.mxu0 %v56_v2  ;;  %v46_v12 = vld [vmem:[#allocation5 + $0x20] sm:$0xff]  ;;  %v45_v13 = vld [vmem:[#allocation5 + $0x18] sm:$0xff]  ;;  %v44_v14 = vld [vmem:[#allocation5 + $0x10] sm:$0xff]  ;;  %p260_p10 = scmp.ne.s32.totalorder %s148_s25, %s259_s26  ;;  %p265_p12 = scmp.lt.s32.totalorder %s259_s26, %s259_s26 }
  0x1f   :  { %179 = vmatprep.subr.mxu0 %v289_v0  ;;  %v43_v15 = vld [vmem:[#allocation5 + $0x8] sm:$0xff]  ;;  %v42_v16 = vld [vmem:[#allocation5] sm:$0xff]  ;;  %v41_v17 = vld [vmem:[#allocation2] sm:$0xff] }
  0x20   :  { %180 = vmatpush3.msra.mxu0 %v55_v3  ;;  %v157_v18 = vld [vmem:[%s326_s2] ss:$0 sm:$0xff]  ;;  %p266_p13 = por %p265_p12, %p264_p11 }
  0x21   :  { %181 = vmatprep.subr.mxu0 %v289_v0 }
  0x22   :  { %182 = vmatpush3.msra.mxu0 %v54_v4  ;;  %p267_p0 = pnand %p266_p13, %p260_p10 }
  0x23   :  { %183 = vmatprep.subr.mxu0 %v289_v0 }
  0x24   :  { %184 = vmatpush3.msra.mxu0 %v53_v5 }
  0x25   :  { %185 = vmatprep.subr.mxu0 %v289_v0 }
  0x26   :  { %186 = vmatpush3.msra.mxu0 %v52_v6 }
  0x27   :  { %187 = vmatprep.subr.mxu0 %v289_v0 }
  0x28   :  { %188 = vmatpush3.msra.mxu0 %v51_v7 }
  0x29   :  { %189 = vmatprep.subr.mxu0 %v289_v0 }
  0x2a   :  { %190 = vmatpush3.msra.mxu0 %v50_v8 }
  0x2b   :  { %191 = vmatprep.subr.mxu0 %v289_v0 }
  0x2c   :  { %192 = vmatpush3.msra.mxu0 %v49_v9 }
  0x2d   :  { %193 = vmatprep.subr.mxu0 %v289_v0 }
  0x2e   :  { %194 = vmatpush3.msra.mxu0 %v48_v10 }
  0x2f   :  { %195 = vmatprep.subr.mxu0 %v289_v0 }
  0x30   :  { %196 = vmatpush3.msra.mxu0 %v47_v11 }
  0x31   :  { %197 = vmatprep.subr.mxu0 %v289_v0 }
  0x32   :  { %198 = vmatpush3.msra.mxu0 %v46_v12 }
  0x33   :  { %199 = vmatprep.subr.mxu0 %v289_v0 }
  0x34   :  { %200 = vmatpush3.msra.mxu0 %v45_v13 }
  0x35   :  { %201 = vmatprep.subr.mxu0 %v289_v0 }
  0x36   :  { %202 = vmatpush3.msra.mxu0 %v44_v14 }
  0x37   :  { %203 = vmatprep.subr.mxu0 %v289_v0 }
  0x38   :  { %204 = vmatpush3.msra.mxu0 %v43_v15 }
  0x39   :  { %205 = vmatprep.subr.mxu0 %v289_v0 }
  0x3a   :  { %206 = vmatpush3.msra.mxu0 %v42_v16 }
  0x3b   :  { %208 = vmatmul.mubr.f32.vlgmr.msra.gmra.mxu0 %v41_v17 }
  0xfb   :  { %v131_v19 = vpop.f32.mrf.mxu0 }
  0xfc   :  { %v132_v20 = vadd.f32 %v157_v18, %v131_v19 }
  0xfd   :  { %v209_v21 = vpop.f32.mrf.mxu0 }
  0xfe   :  { %v136_v22 = vmul.f32 0.70710677, %v132_v20  ;;  %v135_v24 = vmul.f32 0.5, %v132_v20 }
 0x100   :  { %217 = verf.f32 %v136_v22 }
 0x10d   :  { %v218_v23 = vpop.eup %217 }
 0x10e   :  { %v138_v25 = vadd.f32 1.0, %v218_v23 }
 0x110   :  { %v139_v26 = vmul.f32 %v138_v25, %v135_v24 }
 0x112   :  { %140 = vst [vmem:[#allocation7] sm:$0xff] %v139_v26 }
 0x113   :  { %270 = shalt.err (!%p267_p0)
}
 0x114   :  { %150 = dma.vmem_to_hbm [thread:$0]  %s148_s25, 128, %s327_s3, [#allocation4]  }
 0x115   :  { %283 = dma.done.wait [#allocation4], 128  }
 0x116   :  { %284 = vsyncadd [#allocation4], 4294967168 }
 0x117   :  { %154 = vsyncpa [#allocation3], 1 }
 0x118   :  { %155 = vsyncpa [#allocation6], 1 }
 0x119   :  { %156 = vsyncpa [#allocation4], 1 }

</bundles_post_ra>
